<compile_context>
chip_gen: v6e
topology: v6e:2x2x1
jax: 0.10.0
libtpu: 0.0.40
codegen_flags: <defaults>
</compile_context>

<pallas_src>
import jax
import jax.numpy as jnp
import numpy as np
from jax.experimental import pallas as pl
from jax.experimental.pallas import tpu as pltpu


def _stress_grad_kernel(params_ref, strain_ref, out_ref):
    # params_ref: (2,) in SMEM  -> [C1, C2]
    # strain_ref: (3, TM, LANE) VMEM tile (component-major, dense)
    # out_ref   : (3, TM, LANE) VMEM tile (gradient dW/dstrain)
    c1 = jnp.maximum(params_ref[0], 0.0)  # relu(C1)
    c2 = jnp.maximum(params_ref[1], 0.0)  # relu(C2)

    e0 = strain_ref[0]  # (TM, LANE), dense
    e1 = strain_ref[1]
    e2 = strain_ref[2]

    c00 = 2.0 * e0 + 1.0
    c11 = 2.0 * e1 + 1.0
    J = c00 * c11 - e2 * e2

    # dW/dJ = -C1/J + C2*(J-1)   (exact divide: approx reciprocal would break
    # the tolerance check given C1 ~ 1e6; kernel is HBM-bound anyway)
    k = c2 * (J - 1.0) - c1 / J

    two_c1 = 2.0 * c1
    out_ref[0] = two_c1 + k * (2.0 * c11)   # dW/de0
    out_ref[1] = two_c1 + k * (2.0 * c00)   # dW/de1
    out_ref[2] = k * (-2.0 * e2)            # dW/de2


def _choose_tiling(n):
    """Pick a lane width (mult. of 128) and row-block (mult. of 8) for N elems."""
    lane = 512 if n >= 512 else 128
    rows_needed = -(-n // lane)
    rows_block = min(256, ((rows_needed + 7) // 8) * 8)
    rows_total = -(-rows_needed // rows_block) * rows_block
    return lane, rows_block, rows_total


def stress_predictor_component_major(strain_cm, C1, C2):
    """strain_cm: (3, N) float32 component-major -> grad (3, N) float32.

    No transposes: this is the preferred entry point when the surrounding
    pipeline already holds strain components contiguously.
    """
    ncomp, N = strain_cm.shape
    assert ncomp == 3
    params = jnp.stack([jnp.asarray(C1), jnp.asarray(C2)]).astype(jnp.float32)

    lane, rows_block, rows_total = _choose_tiling(N)
    n_pad = rows_total * lane

    x = strain_cm.astype(jnp.float32)
    if n_pad != N:
        # zero padding -> C00=C11=1, J=1: finite, well-defined in the pad region
        x = jnp.pad(x, ((0, 0), (0, n_pad - N)))
    x = x.reshape(3, rows_total, lane)

    out = pl.pallas_call(
        _stress_grad_kernel,
        out_shape=jax.ShapeDtypeStruct((3, rows_total, lane), jnp.float32),
        grid=(rows_total // rows_block,),
        in_specs=[
            pl.BlockSpec(memory_space=pltpu.SMEM),                    # params (2,)
            pl.BlockSpec((3, rows_block, lane), lambda i: (0, i, 0)),  # strain
        ],
        out_specs=pl.BlockSpec((3, rows_block, lane), lambda i: (0, i, 0)),
        compiler_params=pltpu.CompilerParams(
            dimension_semantics=("parallel",)),
    )(params, x)

    out = out.reshape(3, n_pad)
    if n_pad != N:
        out = out[:, :N]
    return out


def stress_predictor(strain, C1, C2):
    """strain: (B, S, 3) float32 -> grad dW/dstrain: (B, S, 3) float32."""
    B, S, ncomp = strain.shape
    assert ncomp == 3
    # TODO(synk): these two transposes are pure layout glue (extra HBM
    # read+write each); callers that can hold strain component-major should
    # use stress_predictor_component_major directly.
    strain_cm = jnp.transpose(strain.astype(jnp.float32), (2, 0, 1)).reshape(3, B * S)
    out_cm = stress_predictor_component_major(strain_cm, C1, C2)
    return jnp.transpose(out_cm.reshape(3, B, S), (1, 2, 0))


def _reference_grad(strain, C1, C2):
    """Pure-JAX reference: autodiff of W w.r.t. strain (matches torch.autograd.grad)."""
    c1 = jnp.maximum(C1, 0.0)
    c2 = jnp.maximum(C2, 0.0)

    def W_sum(s):
        e0, e1, e2 = s[..., 0], s[..., 1], s[..., 2]
        c00 = 2.0 * e0 + 1.0
        c11 = 2.0 * e1 + 1.0
        I1 = c00 + c11
        J = c00 * c11 - e2 * e2
        W = c1 * (I1 - 2.0) - c1 * jnp.log(J) + 0.5 * c2 * (J - 1.0) ** 2
        return jnp.sum(W)

    return jax.grad(W_sum)(strain)


if __name__ == "__main__":
    key = jax.random.PRNGKey(0)
    C1 = jnp.float32(1000000.0)
    C2 = jnp.float32(1000000.0)

    # Both the kernel's analytic gradient and the f32 autodiff reference
    # evaluate near-cancelling terms of magnitude ~2*C1 ~ 2e6, so each output
    # element carries an inherent absolute rounding error of a few f32 ulps at
    # that scale (eps_f32 * 2e6 ~ 0.25).  Size atol accordingly (rtol alone is
    # meaningless for the near-zero cancelled outputs).
    atol = 32.0 * float(np.finfo(np.float32).eps) * float(max(C1, C2))  # ~3.8

    # Case 1: small PyTorch-like shape (batches=2, steps=8, 3 strain comps).
    k1, k2 = jax.random.split(key)
    strain = jax.random.uniform(k1, (2, 8, 3), dtype=jnp.float32,
                                minval=-0.05, maxval=0.05)  # small strains keep J > 0
    grad = jax.block_until_ready(stress_predictor(strain, C1, C2))
    ref = _reference_grad(strain, C1, C2)
    np.testing.assert_allclose(np.asarray(grad), np.asarray(ref),
                               rtol=1e-4, atol=atol)

    # Case 2: a modestly larger shape that exercises the wide-lane/padded path.
    strain2 = jax.random.uniform(k2, (4, 700, 3), dtype=jnp.float32,
                                 minval=-0.05, maxval=0.05)
    grad2 = jax.block_until_ready(stress_predictor(strain2, C1, C2))
    ref2 = _reference_grad(strain2, C1, C2)
    np.testing.assert_allclose(np.asarray(grad2), np.asarray(ref2),
                               rtol=1e-4, atol=atol)

    print("KERNEL_OK")
</pallas_src>

<mosaic_0001>
module attributes {stable_mosaic.version = 11 : i64} {
  func.func @_stress_grad_kernel(%arg0: i32, %arg1: memref<2xf32, #tpu.memory_space<smem>>, %arg2: memref<3x8x128xf32, #tpu.memory_space<vmem>>, %arg3: memref<3x8x128xf32, #tpu.memory_space<vmem>>) attributes {dimension_semantics = [#tpu.dimension_semantics<parallel>], iteration_bounds = array<i64: 1>, scalar_prefetch = 0 : i64, scratch_operands = 0 : i64, tpu.core_type = #tpu.core_type<tc>, window_params = [{transform_indices = @transform_0, window_bounds = array<i64: 2>}, {transform_indices = @transform_1, window_bounds = array<i64: 3, 8, 128>}, {transform_indices = @transform_2, window_bounds = array<i64: 3, 8, 128>}]} {
    %c0 = arith.constant 0 : index
    %0 = memref.load %arg1[%c0] : memref<2xf32, #tpu.memory_space<smem>>
    %cst = arith.constant 0.000000e+00 : f32
    %1 = arith.maximumf %0, %cst : f32
    %c1 = arith.constant 1 : index
    %2 = memref.load %arg1[%c1] : memref<2xf32, #tpu.memory_space<smem>>
    %cst_0 = arith.constant 0.000000e+00 : f32
    %3 = arith.maximumf %2, %cst_0 : f32
    %c0_1 = arith.constant 0 : index
    %c0_2 = arith.constant 0 : index
    %c0_3 = arith.constant 0 : index
    %4 = vector.load %arg2[%c0_1, %c0_2, %c0_3] : memref<3x8x128xf32, #tpu.memory_space<vmem>>, vector<1x8x128xf32>
    %5 = vector.shape_cast %4 : vector<1x8x128xf32> to vector<8x128xf32>
    %c1_4 = arith.constant 1 : index
    %c0_5 = arith.constant 0 : index
    %c0_6 = arith.constant 0 : index
    %6 = vector.load %arg2[%c1_4, %c0_5, %c0_6] : memref<3x8x128xf32, #tpu.memory_space<vmem>>, vector<1x8x128xf32>
    %7 = vector.shape_cast %6 : vector<1x8x128xf32> to vector<8x128xf32>
    %c2 = arith.constant 2 : index
    %c0_7 = arith.constant 0 : index
    %c0_8 = arith.constant 0 : index
    %8 = vector.load %arg2[%c2, %c0_7, %c0_8] : memref<3x8x128xf32, #tpu.memory_space<vmem>>, vector<1x8x128xf32>
    %9 = vector.shape_cast %8 : vector<1x8x128xf32> to vector<8x128xf32>
    %cst_9 = arith.constant 2.000000e+00 : f32
    %10 = vector.broadcast %cst_9 : f32 to vector<8x128xf32>
    %11 = arith.mulf %10, %5 : vector<8x128xf32>
    %cst_10 = arith.constant 1.000000e+00 : f32
    %12 = vector.broadcast %cst_10 : f32 to vector<8x128xf32>
    %13 = arith.addf %11, %12 : vector<8x128xf32>
    %cst_11 = arith.constant 2.000000e+00 : f32
    %14 = vector.broadcast %cst_11 : f32 to vector<8x128xf32>
    %15 = arith.mulf %14, %7 : vector<8x128xf32>
    %cst_12 = arith.constant 1.000000e+00 : f32
    %16 = vector.broadcast %cst_12 : f32 to vector<8x128xf32>
    %17 = arith.addf %15, %16 : vector<8x128xf32>
    %18 = arith.mulf %13, %17 : vector<8x128xf32>
    %19 = arith.mulf %9, %9 : vector<8x128xf32>
    %20 = arith.subf %18, %19 : vector<8x128xf32>
    %cst_13 = arith.constant 1.000000e+00 : f32
    %21 = vector.broadcast %cst_13 : f32 to vector<8x128xf32>
    %22 = arith.subf %20, %21 : vector<8x128xf32>
    %23 = vector.broadcast %3 : f32 to vector<8x128xf32>
    %24 = arith.mulf %23, %22 : vector<8x128xf32>
    %25 = vector.broadcast %1 : f32 to vector<8x128xf32>
    %26 = arith.divf %25, %20 : vector<8x128xf32>
    %27 = arith.subf %24, %26 : vector<8x128xf32>
    %cst_14 = arith.constant 2.000000e+00 : f32
    %28 = arith.mulf %cst_14, %1 : f32
    %cst_15 = arith.constant 2.000000e+00 : f32
    %29 = vector.broadcast %cst_15 : f32 to vector<8x128xf32>
    %30 = arith.mulf %29, %17 : vector<8x128xf32>
    %31 = arith.mulf %27, %30 : vector<8x128xf32>
    %32 = vector.broadcast %28 : f32 to vector<8x128xf32>
    %33 = arith.addf %32, %31 : vector<8x128xf32>
    %c0_16 = arith.constant 0 : index
    %c0_17 = arith.constant 0 : index
    %c0_18 = arith.constant 0 : index
    %34 = vector.load %arg3[%c0_16, %c0_17, %c0_18] : memref<3x8x128xf32, #tpu.memory_space<vmem>>, vector<1x8x128xf32>
    %35 = vector.shape_cast %34 : vector<1x8x128xf32> to vector<8x128xf32>
    %36 = vector.shape_cast %33 : vector<8x128xf32> to vector<1x8x128xf32>
    tpu.vector_store %arg3[%c0_16, %c0_17, %c0_18], %36 {strides = array<i32>} : memref<3x8x128xf32, #tpu.memory_space<vmem>>, vector<1x8x128xf32>,
    %cst_19 = arith.constant 2.000000e+00 : f32
    %37 = vector.broadcast %cst_19 : f32 to vector<8x128xf32>
    %38 = arith.mulf %37, %13 : vector<8x128xf32>
    %39 = arith.mulf %27, %38 : vector<8x128xf32>
    %40 = vector.broadcast %28 : f32 to vector<8x128xf32>
    %41 = arith.addf %40, %39 : vector<8x128xf32>
    %c1_20 = arith.constant 1 : index
    %c0_21 = arith.constant 0 : index
    %c0_22 = arith.constant 0 : index
    %42 = vector.load %arg3[%c1_20, %c0_21, %c0_22] : memref<3x8x128xf32, #tpu.memory_space<vmem>>, vector<1x8x128xf32>
    %43 = vector.shape_cast %42 : vector<1x8x128xf32> to vector<8x128xf32>
    %44 = vector.shape_cast %41 : vector<8x128xf32> to vector<1x8x128xf32>
    tpu.vector_store %arg3[%c1_20, %c0_21, %c0_22], %44 {strides = array<i32>} : memref<3x8x128xf32, #tpu.memory_space<vmem>>, vector<1x8x128xf32>,
    %cst_23 = arith.constant -2.000000e+00 : f32
    %45 = vector.broadcast %cst_23 : f32 to vector<8x128xf32>
    %46 = arith.mulf %45, %9 : vector<8x128xf32>
    %47 = arith.mulf %27, %46 : vector<8x128xf32>
    %c2_24 = arith.constant 2 : index
    %c0_25 = arith.constant 0 : index
    %c0_26 = arith.constant 0 : index
    %48 = vector.load %arg3[%c2_24, %c0_25, %c0_26] : memref<3x8x128xf32, #tpu.memory_space<vmem>>, vector<1x8x128xf32>
    %49 = vector.shape_cast %48 : vector<1x8x128xf32> to vector<8x128xf32>
    %50 = vector.shape_cast %47 : vector<8x128xf32> to vector<1x8x128xf32>
    tpu.vector_store %arg3[%c2_24, %c0_25, %c0_26], %50 {strides = array<i32>} : memref<3x8x128xf32, #tpu.memory_space<vmem>>, vector<1x8x128xf32>,
    return
  }
  func.func @transform_0(%arg0: i32) -> i32 {
    %c0_i32 = arith.constant 0 : i32
    %c0_i32_0 = arith.constant 0 : i32
    return %c0_i32 : i32
  }
  func.func @transform_1(%arg0: i32) -> (i32, i32, i32) {
    %c0_i32 = arith.constant 0 : i32
    %c0_i32_0 = arith.constant 0 : i32
    %c0_i32_1 = arith.constant 0 : i32
    return %c0_i32, %arg0, %c0_i32_0 : i32, i32, i32
  }
  func.func @transform_2(%arg0: i32) -> (i32, i32, i32) {
    %c0_i32 = arith.constant 0 : i32
    %c0_i32_0 = arith.constant 0 : i32
    %c0_i32_1 = arith.constant 0 : i32
    return %c0_i32, %arg0, %c0_i32_0 : i32, i32, i32
  }
}

</mosaic_0001>

<bundles_post_ra>
// kernel: tpu_custom_call.1
= control target key start
LH: loop header
LB: loop body
LE: loop exit
PB: predicated region body
PF: predicated region fallthrough
CT: control target
= control target key end

     0   :  { %7 = vsyncpa [#allocation5], 0  ;;  %s193_s0 = inlined_call_operand.hbm [shape: f32[2], index: 0, kind: input, shape index: {}]   ;;  %s194_s1 = inlined_call_operand.hbm [shape: f32[3,8,128], index: 1, kind: input, shape index: {}]   ;;  %s195_s2 = inlined_call_operand.hbm [shape: f32[3,8,128], index: 2, kind: output, shape index: {}]  }
   0x1   :  { %8 = vsyncpa [#allocation3], 0 }
   0x2   :  { %9 = vsyncpa [#allocation4], 0  ;;  %s157_s9 = smov [#allocation2]   ;;  %s158_s12 = smov [#allocation6]  }
   0x3   :  { %17 = dma.hbm_to_smem %s193_s0, 16, %s157_s9, [#allocation5]  }
   0x4   :  { %s23_s13 = sshll.u32 %s158_s12, 4  ;;  %s24_s13 = int_to_ptr.vmem [resolvable:$true] %s23_s13 }
   0x5   :  { %s119_s14 = scalar_lea.vmem %s24_s13, 384  ;;  %p124_p1 = scmp.lt.s32.totalorder %s24_s13, %s24_s13 }
   0x6   :  { %p120_p0 = scmp.ne.s32.totalorder %s24_s13, %s119_s14  ;;  %p125_p2 = scmp.lt.s32.totalorder %s119_s14, %s119_s14 }
   0x8   :  { %p126_p3 = por %p125_p2, %p124_p1 }
   0xa   :  { %p127_p4 = pnand %p126_p3, %p120_p0 }
   0xc   :  { %130 = shalt.err (!%p127_p4)
}
   0xd   :  { %s159_s15 = smov 128   ;;  %s160_s16 = smov 8  }
   0xe   :  { %29 = dma.hbm_to_vmem [thread:$0]  %s194_s1, 384, %s24_s13, [#allocation3], %s159_s15, %s159_s15, %s160_s16  }
   0xf   :  { %151 = dma.done.wait [#allocation5], 16  }
  0x10   :  { %152 = vsyncadd [#allocation5], 4294967280 }
  0x11   :  { %153 = dma.done.wait [#allocation3], 384  }
  0x12   :  { %154 = vsyncadd [#allocation3], 4294966912 }
  0x13   :  { %36 = sfence }
  0x14   :  { %v41_v0 = vld [vmem:[#allocation6] sm:$0xff]  ;;  %v43_v1 = vld [vmem:[#allocation6 + $0x8] sm:$0xff]  ;;  %v45_v2 = vld [vmem:[#allocation6 + $0x10] sm:$0xff]  ;;  %s93_s0 = sld [smem:[#allocation2 + $0x1]]  ;;  %s161_s20 = smov 0.0  }
  0x15   :  { %v46_v3 = vmul.f32 2.0, %v41_v0  ;;  %v48_v4 = vmul.f32 2.0, %v43_v1  ;;  %v51_v7 = vmul.f32 %v45_v2, %v45_v2  ;;  %s37_s19 = sld [smem:[#allocation2]]  ;;  %v71_v18 = vmul.f32 -2.0, %v45_v2  ;;  %s162_s23 = smov [#allocation7]  }
  0x16   :  { %s80_s24 = sshll.u32 %s162_s23, 4  ;;  %s81_s24 = int_to_ptr.vmem [resolvable:$true] %s80_s24 }
  0x17   :  { %v47_v5 = vadd.f32 1.0, %v46_v3  ;;  %v49_v6 = vadd.f32 1.0, %v48_v4  ;;  %s131_s25 = scalar_lea.vmem %s81_s24, 384  ;;  %p136_p6 = scmp.lt.s32.totalorder %s81_s24, %s81_s24 }
  0x18   :  { %p132_p5 = scmp.ne.s32.totalorder %s81_s24, %s131_s25  ;;  %p137_p7 = scmp.lt.s32.totalorder %s131_s25, %s131_s25 }
  0x19   :  { %v50_v8 = vmul.f32 %v49_v6, %v47_v5  ;;  %v61_v16 = vmul.f32 2.0, %v49_v6  ;;  %v66_v17 = vmul.f32 2.0, %v47_v5 }
  0x1a   :  { %s40_s1 = smax.f32 %s161_s20, %s93_s0  ;;  %p138_p8 = por %p137_p7, %p136_p6 }
  0x1b   :  { %v52_v9 = vsub.f32 %v50_v8, %v51_v7  ;;  %s38_s21 = smax.f32 %s161_s20, %s37_s19  ;;  %v54_v11 = vstv %s40_s1 }
  0x1c   :  { %v56_v12 = vstv %s38_s21  ;;  %s60_s22 = smul.f32 2.0, %s38_s21  ;;  %p139_p9 = pnand %p138_p8, %p132_p5 }
  0x1d   :  { %101 = vrcp.f32 %v52_v9  ;;  %v94_v10 = vadd.f32 -1.0, %v52_v9 }
  0x1e   :  { %v63_v20 = vstv %s60_s22 }
  0x1f   :  { %v55_v13 = vmul.f32 %v94_v10, %v54_v11 }
  0x2a   :  { %v102_v14 = vpop.eup %101 }
  0x2b   :  { %v58_v15 = vmul.f32 %v102_v14, %v56_v12 }
  0x2d   :  { %v59_v19 = vsub.f32 %v55_v13, %v58_v15 }
  0x2f   :  { %v62_v21 = vmul.f32 %v61_v16, %v59_v19  ;;  %v67_v22 = vmul.f32 %v66_v17, %v59_v19  ;;  %v72_v23 = vmul.f32 %v71_v18, %v59_v19 }
  0x31   :  { %v64_v24 = vadd.f32 %v63_v20, %v62_v21  ;;  %v68_v25 = vadd.f32 %v67_v22, %v63_v20  ;;  %74 = vst [vmem:[#allocation7 + $0x10] sm:$0xff] %v72_v23 }
  0x33   :  { %65 = vst [vmem:[#allocation7] sm:$0xff] %v64_v24  ;;  %70 = vst [vmem:[#allocation7 + $0x8] sm:$0xff] %v68_v25 }
  0x34   :  { %142 = shalt.err (!%p139_p9)
}
  0x35   :  { %86 = dma.vmem_to_hbm [thread:$0]  %s81_s24, 384, %s195_s2, [#allocation4], %s159_s15, %s159_s15, %s160_s16  }
  0x36   :  { %155 = dma.done.wait [#allocation4], 384  }
  0x37   :  { %156 = vsyncadd [#allocation4], 4294966912 }
  0x38   :  { %90 = vsyncpa [#allocation3], 1 }
  0x39   :  { %91 = vsyncpa [#allocation4], 1 }
  0x3a   :  { %92 = vsyncpa [#allocation5], 1 }

</bundles_post_ra>
